<compile_context>
chip_gen: v5e
topology: v5e:2x2
jax: 0.10.0
libtpu: 0.0.40
codegen_flags: <defaults>
</compile_context>

<pallas_src>
import jax
import jax.numpy as jnp
from jax.experimental import pallas as pl
from jax.experimental.pallas import tpu as pltpu


def storyteller_kernel(idx_ref, emb_ref, w1_ref, w2_ref, w3_ref, bcat_ref,
                       o_ref, x_scratch):
    ctx = idx_ref.shape[0]
    emb_dim = emb_ref.shape[1]
    h1_dim = w1_ref.shape[1]
    h2_dim = w2_ref.shape[1]
    vocab = w3_ref.shape[1]

    # --- embedding gather: direct dynamic row loads (indices in SMEM),
    #     assembled (flattened) into VMEM scratch. ctx is a Python int ->
    #     fully unrolled, static lane offsets for the stores.
    for b in range(ctx):
        row = emb_ref[pl.ds(idx_ref[b], 1), :]                  # (1, E) dynamic row
        x_scratch[:, pl.ds(b * emb_dim, emb_dim)] = row

    x = x_scratch[...].astype(jnp.bfloat16)                     # (1, CTX*E)

    # --- static slices of the concatenated f32 bias vector ---
    b1 = bcat_ref[:, pl.ds(0, h1_dim)]
    b2 = bcat_ref[:, pl.ds(h1_dim, h2_dim)]
    b3 = bcat_ref[:, pl.ds(h1_dim + h2_dim, vocab)]

    # --- linear1 + ReLU: single MXU matmul, f32 accumulation ---
    h1 = jnp.dot(x, w1_ref[...], preferred_element_type=jnp.float32) + b1
    h1 = jnp.maximum(h1, 0.0)

    # --- linear2 + ReLU ---
    h2 = jnp.dot(h1.astype(jnp.bfloat16), w2_ref[...],
                 preferred_element_type=jnp.float32) + b2
    h2 = jnp.maximum(h2, 0.0)

    # --- linear3 ---
    logits = jnp.dot(h2.astype(jnp.bfloat16), w3_ref[...],
                     preferred_element_type=jnp.float32) + b3

    # --- log_softmax over dim=1 (f32 on VPU/EUP) ---
    m = jnp.max(logits, axis=-1, keepdims=True)
    shifted = logits - m
    lse = jnp.log(jnp.sum(jnp.exp(shifted), axis=-1, keepdims=True))
    o_ref[...] = shifted - lse


def prepare_params(emb, w1, b1, w2, b2, w3, b3):
    """One-time parameter preparation (do NOT redo per forward call).

    * w1/w2/w3 -> bf16 (MXU inputs only; halves weight-DMA bytes).
    * b1|b2|b3 -> single f32 (1, 128+512+256) tensor (one DMA instead of 3).
    * embedding table and biases stay f32 (accumulation/epilogue stay f32).
    """
    w1b = w1.astype(jnp.bfloat16)
    w2b = w2.astype(jnp.bfloat16)
    w3b = w3.astype(jnp.bfloat16)
    b_cat = jnp.concatenate([b1, b2, b3], axis=1).astype(jnp.float32)
    return (emb.astype(jnp.float32), w1b, w2b, w3b, b_cat)


def storyteller_forward(idx, prepared):
    emb, w1b, w2b, w3b, b_cat = prepared
    vocab_rows, emb_dim = emb.shape
    ctx = idx.shape[0]
    vocab = w3b.shape[1]

    def full_spec(arr):
        # full-array block; index_map gets (grid_i, idx_prefetch_ref)
        return pl.BlockSpec(arr.shape, lambda i, idx_r: (0, 0))

    # Advisory cost estimate so XLA can overlap the custom call.
    flops = 2 * (w1b.shape[0] * w1b.shape[1]
                 + w2b.shape[0] * w2b.shape[1]
                 + w3b.shape[0] * w3b.shape[1])
    bytes_accessed = (emb.size * 4
                      + (w1b.size + w2b.size + w3b.size) * 2
                      + b_cat.size * 4 + ctx * 4 + vocab * 4)
    cost = pl.CostEstimate(flops=flops, transcendentals=vocab + 1,
                           bytes_accessed=bytes_accessed)

    grid_spec = pltpu.PrefetchScalarGridSpec(
        num_scalar_prefetch=1,
        grid=(1,),
        in_specs=[full_spec(emb), full_spec(w1b), full_spec(w2b),
                  full_spec(w3b), full_spec(b_cat)],
        out_specs=pl.BlockSpec((1, vocab), lambda i, idx_r: (0, 0)),
        scratch_shapes=[pltpu.VMEM((1, ctx * emb_dim), jnp.float32)],
    )
    return pl.pallas_call(
        storyteller_kernel,
        out_shape=jax.ShapeDtypeStruct((1, vocab), jnp.float32),
        grid_spec=grid_spec,
        cost_estimate=cost,
        compiler_params=pltpu.CompilerParams(dimension_semantics=("arbitrary",)),
    )(idx.astype(jnp.int32), emb, w1b, w2b, w3b, b_cat)


if __name__ == "__main__":
    # vocab_size, embedding_dim, batch_size (context length in this module)
    VOCAB, EMB_DIM, CTX = 256, 16, 8

    key = jax.random.PRNGKey(0)
    ks = jax.random.split(key, 8)
    emb = jax.random.normal(ks[0], (VOCAB, EMB_DIM), jnp.float32) * 0.10
    w1 = jax.random.normal(ks[1], (CTX * EMB_DIM, 128), jnp.float32) * 0.05
    b1 = jax.random.normal(ks[2], (1, 128), jnp.float32) * 0.01
    w2 = jax.random.normal(ks[3], (128, 512), jnp.float32) * 0.05
    b2 = jax.random.normal(ks[4], (1, 512), jnp.float32) * 0.01
    w3 = jax.random.normal(ks[5], (512, VOCAB), jnp.float32) * 0.05
    b3 = jax.random.normal(ks[6], (1, VOCAB), jnp.float32) * 0.01
    idx = jax.random.randint(ks[7], (CTX,), 0, VOCAB, jnp.int32)

    # One-time prep (bf16 weights + concatenated biases); reused across calls.
    prepared = jax.block_until_ready(prepare_params(emb, w1, b1, w2, b2, w3, b3))

    out = jax.block_until_ready(storyteller_forward(idx, prepared))

    # pure-JAX f32 reference (mirrors the PyTorch forward exactly)
    x = emb[idx].reshape(1, -1)
    h1 = jnp.maximum(x @ w1 + b1, 0.0)
    h2 = jnp.maximum(h1 @ w2 + b2, 0.0)
    ref = jax.nn.log_softmax(h2 @ w3 + b3, axis=1)

    assert out.shape == (1, VOCAB)
    # bf16 MXU inputs => quantization error vs the f32 reference is expected;
    # loosen the tolerance accordingly (log-probs still agree to ~1e-3).
    err = float(jnp.max(jnp.abs(out - ref)))
    assert jnp.allclose(out, ref, atol=2e-2, rtol=0.0), f"max abs err {err}"
    print("KERNEL_OK")
</pallas_src>

<mosaic_0001>
module attributes {stable_mosaic.version = 11 : i64} {
  func.func @storyteller_kernel(%arg0: i32, %arg1: memref<8xi32, #tpu.memory_space<smem>>, %arg2: memref<256x16xf32, #tpu.memory_space<vmem>>, %arg3: memref<128x128xbf16, #tpu.memory_space<vmem>>, %arg4: memref<128x512xbf16, #tpu.memory_space<vmem>>, %arg5: memref<512x256xbf16, #tpu.memory_space<vmem>>, %arg6: memref<1x896xf32, #tpu.memory_space<vmem>>, %arg7: memref<1x256xf32, #tpu.memory_space<vmem>>, %arg8: memref<1x128xf32, #tpu.memory_space<vmem>>) attributes {dimension_semantics = [#tpu.dimension_semantics<arbitrary>], iteration_bounds = array<i64: 1>, scalar_prefetch = 1 : i64, scratch_operands = 1 : i64, tpu.core_type = #tpu.core_type<tc>, window_params = [{pipeline_mode = #tpu.pipeline_mode<synchronous>, transform_indices = @transform_0, window_bounds = array<i64: 256, 16>}, {pipeline_mode = #tpu.pipeline_mode<synchronous>, transform_indices = @transform_1, window_bounds = array<i64: 128, 128>}, {pipeline_mode = #tpu.pipeline_mode<synchronous>, transform_indices = @transform_2, window_bounds = array<i64: 128, 512>}, {pipeline_mode = #tpu.pipeline_mode<synchronous>, transform_indices = @transform_3, window_bounds = array<i64: 512, 256>}, {pipeline_mode = #tpu.pipeline_mode<synchronous>, transform_indices = @transform_4, window_bounds = array<i64: 1, 896>}, {pipeline_mode = #tpu.pipeline_mode<synchronous>, transform_indices = @transform_5, window_bounds = array<i64: 1, 256>}]} {
    %c0 = arith.constant 0 : index
    %0 = memref.load %arg1[%c0] : memref<8xi32, #tpu.memory_space<smem>>
    %1 = arith.index_cast %0 : i32 to index
    %c0_0 = arith.constant 0 : index
    %2 = vector.load %arg2[%1, %c0_0] : memref<256x16xf32, #tpu.memory_space<vmem>>, vector<1x16xf32>
    %c0_1 = arith.constant 0 : index
    %c0_2 = arith.constant 0 : index
    %3 = vector.load %arg8[%c0_1, %c0_2] : memref<1x128xf32, #tpu.memory_space<vmem>>, vector<1x16xf32>
    tpu.vector_store %arg8[%c0_1, %c0_2], %2 {strides = array<i32>} : memref<1x128xf32, #tpu.memory_space<vmem>>, vector<1x16xf32>,
    %c1 = arith.constant 1 : index
    %4 = memref.load %arg1[%c1] : memref<8xi32, #tpu.memory_space<smem>>
    %5 = arith.index_cast %4 : i32 to index
    %c0_3 = arith.constant 0 : index
    %6 = vector.load %arg2[%5, %c0_3] : memref<256x16xf32, #tpu.memory_space<vmem>>, vector<1x16xf32>
    %c0_4 = arith.constant 0 : index
    %c16 = arith.constant 16 : index
    %7 = vector.load %arg8[%c0_4, %c16] : memref<1x128xf32, #tpu.memory_space<vmem>>, vector<1x16xf32>
    tpu.vector_store %arg8[%c0_4, %c16], %6 {strides = array<i32>} : memref<1x128xf32, #tpu.memory_space<vmem>>, vector<1x16xf32>,
    %c2 = arith.constant 2 : index
    %8 = memref.load %arg1[%c2] : memref<8xi32, #tpu.memory_space<smem>>
    %9 = arith.index_cast %8 : i32 to index
    %c0_5 = arith.constant 0 : index
    %10 = vector.load %arg2[%9, %c0_5] : memref<256x16xf32, #tpu.memory_space<vmem>>, vector<1x16xf32>
    %c0_6 = arith.constant 0 : index
    %c32 = arith.constant 32 : index
    %11 = vector.load %arg8[%c0_6, %c32] : memref<1x128xf32, #tpu.memory_space<vmem>>, vector<1x16xf32>
    tpu.vector_store %arg8[%c0_6, %c32], %10 {strides = array<i32>} : memref<1x128xf32, #tpu.memory_space<vmem>>, vector<1x16xf32>,
    %c3 = arith.constant 3 : index
    %12 = memref.load %arg1[%c3] : memref<8xi32, #tpu.memory_space<smem>>
    %13 = arith.index_cast %12 : i32 to index
    %c0_7 = arith.constant 0 : index
    %14 = vector.load %arg2[%13, %c0_7] : memref<256x16xf32, #tpu.memory_space<vmem>>, vector<1x16xf32>
    %c0_8 = arith.constant 0 : index
    %c48 = arith.constant 48 : index
    %15 = vector.load %arg8[%c0_8, %c48] : memref<1x128xf32, #tpu.memory_space<vmem>>, vector<1x16xf32>
    tpu.vector_store %arg8[%c0_8, %c48], %14 {strides = array<i32>} : memref<1x128xf32, #tpu.memory_space<vmem>>, vector<1x16xf32>,
    %c4 = arith.constant 4 : index
    %16 = memref.load %arg1[%c4] : memref<8xi32, #tpu.memory_space<smem>>
    %17 = arith.index_cast %16 : i32 to index
    %c0_9 = arith.constant 0 : index
    %18 = vector.load %arg2[%17, %c0_9] : memref<256x16xf32, #tpu.memory_space<vmem>>, vector<1x16xf32>
    %c0_10 = arith.constant 0 : index
    %c64 = arith.constant 64 : index
    %19 = vector.load %arg8[%c0_10, %c64] : memref<1x128xf32, #tpu.memory_space<vmem>>, vector<1x16xf32>
    tpu.vector_store %arg8[%c0_10, %c64], %18 {strides = array<i32>} : memref<1x128xf32, #tpu.memory_space<vmem>>, vector<1x16xf32>,
    %c5 = arith.constant 5 : index
    %20 = memref.load %arg1[%c5] : memref<8xi32, #tpu.memory_space<smem>>
    %21 = arith.index_cast %20 : i32 to index
    %c0_11 = arith.constant 0 : index
    %22 = vector.load %arg2[%21, %c0_11] : memref<256x16xf32, #tpu.memory_space<vmem>>, vector<1x16xf32>
    %c0_12 = arith.constant 0 : index
    %c80 = arith.constant 80 : index
    %23 = vector.load %arg8[%c0_12, %c80] : memref<1x128xf32, #tpu.memory_space<vmem>>, vector<1x16xf32>
    tpu.vector_store %arg8[%c0_12, %c80], %22 {strides = array<i32>} : memref<1x128xf32, #tpu.memory_space<vmem>>, vector<1x16xf32>,
    %c6 = arith.constant 6 : index
    %24 = memref.load %arg1[%c6] : memref<8xi32, #tpu.memory_space<smem>>
    %25 = arith.index_cast %24 : i32 to index
    %c0_13 = arith.constant 0 : index
    %26 = vector.load %arg2[%25, %c0_13] : memref<256x16xf32, #tpu.memory_space<vmem>>, vector<1x16xf32>
    %c0_14 = arith.constant 0 : index
    %c96 = arith.constant 96 : index
    %27 = vector.load %arg8[%c0_14, %c96] : memref<1x128xf32, #tpu.memory_space<vmem>>, vector<1x16xf32>
    tpu.vector_store %arg8[%c0_14, %c96], %26 {strides = array<i32>} : memref<1x128xf32, #tpu.memory_space<vmem>>, vector<1x16xf32>,
    %c7 = arith.constant 7 : index
    %28 = memref.load %arg1[%c7] : memref<8xi32, #tpu.memory_space<smem>>
    %29 = arith.index_cast %28 : i32 to index
    %c0_15 = arith.constant 0 : index
    %30 = vector.load %arg2[%29, %c0_15] : memref<256x16xf32, #tpu.memory_space<vmem>>, vector<1x16xf32>
    %c0_16 = arith.constant 0 : index
    %c112 = arith.constant 112 : index
    %31 = vector.load %arg8[%c0_16, %c112] : memref<1x128xf32, #tpu.memory_space<vmem>>, vector<1x16xf32>
    tpu.vector_store %arg8[%c0_16, %c112], %30 {strides = array<i32>} : memref<1x128xf32, #tpu.memory_space<vmem>>, vector<1x16xf32>,
    %c0_17 = arith.constant 0 : index
    %c0_18 = arith.constant 0 : index
    %32 = vector.load %arg8[%c0_17, %c0_18] : memref<1x128xf32, #tpu.memory_space<vmem>>, vector<1x128xf32>
    %33 = arith.truncf %32 : vector<1x128xf32> to vector<1x128xbf16>
    %c0_19 = arith.constant 0 : index
    %c0_20 = arith.constant 0 : index
    %34 = vector.load %arg6[%c0_19, %c0_20] : memref<1x896xf32, #tpu.memory_space<vmem>>, vector<1x128xf32>
    %c0_21 = arith.constant 0 : index
    %c128 = arith.constant 128 : index
    %35 = vector.load %arg6[%c0_21, %c128] : memref<1x896xf32, #tpu.memory_space<vmem>>, vector<1x512xf32>
    %c0_22 = arith.constant 0 : index
    %c640 = arith.constant 640 : index
    %36 = vector.load %arg6[%c0_22, %c640] : memref<1x896xf32, #tpu.memory_space<vmem>>, vector<1x256xf32>
    %c0_23 = arith.constant 0 : index
    %c0_24 = arith.constant 0 : index
    %37 = vector.load %arg3[%c0_23, %c0_24] : memref<128x128xbf16, #tpu.memory_space<vmem>>, vector<128x128xbf16>
    %cst = arith.constant dense<0.000000e+00> : vector<1x128xf32>
    %38 = tpu.matmul %33, %37, %cst {dimension_numbers = #tpu.dot_dimension_numbers<[1], [0], [0], [1], [0, 0, 1, 1], [], []>} : vector<1x128xbf16>, vector<128x128xbf16>, vector<1x128xf32> -> vector<1x128xf32>
    %39 = arith.addf %38, %34 : vector<1x128xf32>
    %cst_25 = arith.constant 0.000000e+00 : f32
    %40 = vector.broadcast %cst_25 : f32 to vector<1x128xf32>
    %41 = arith.maximumf %39, %40 : vector<1x128xf32>
    %42 = arith.truncf %41 : vector<1x128xf32> to vector<1x128xbf16>
    %c0_26 = arith.constant 0 : index
    %c0_27 = arith.constant 0 : index
    %43 = vector.load %arg4[%c0_26, %c0_27] : memref<128x512xbf16, #tpu.memory_space<vmem>>, vector<128x512xbf16>
    %cst_28 = arith.constant dense<0.000000e+00> : vector<1x512xf32>
    %44 = tpu.matmul %42, %43, %cst_28 {dimension_numbers = #tpu.dot_dimension_numbers<[1], [0], [0], [1], [0, 0, 1, 1], [], []>} : vector<1x128xbf16>, vector<128x512xbf16>, vector<1x512xf32> -> vector<1x512xf32>
    %45 = arith.addf %44, %35 : vector<1x512xf32>
    %cst_29 = arith.constant 0.000000e+00 : f32
    %46 = vector.broadcast %cst_29 : f32 to vector<1x512xf32>
    %47 = arith.maximumf %45, %46 : vector<1x512xf32>
    %48 = arith.truncf %47 : vector<1x512xf32> to vector<1x512xbf16>
    %c0_30 = arith.constant 0 : index
    %c0_31 = arith.constant 0 : index
    %49 = vector.load %arg5[%c0_30, %c0_31] : memref<512x256xbf16, #tpu.memory_space<vmem>>, vector<512x256xbf16>
    %cst_32 = arith.constant dense<0.000000e+00> : vector<1x256xf32>
    %50 = tpu.matmul %48, %49, %cst_32 {dimension_numbers = #tpu.dot_dimension_numbers<[1], [0], [0], [1], [0, 0, 1, 1], [], []>} : vector<1x512xbf16>, vector<512x256xbf16>, vector<1x256xf32> -> vector<1x256xf32>
    %51 = arith.addf %50, %36 : vector<1x256xf32>
    %cst_33 = arith.constant dense<0xFF800000> : vector<1xf32>
    %52 = vector.multi_reduction <maximumf>, %51, %cst_33 [1] : vector<1x256xf32> to vector<1xf32>
    %53 = vector.shape_cast %52 : vector<1xf32> to vector<1x1xf32>
    %54 = vector.broadcast %53 : vector<1x1xf32> to vector<1x256xf32>
    %55 = arith.subf %51, %54 : vector<1x256xf32>
    %56 = math.exp %55 : vector<1x256xf32>
    %cst_34 = arith.constant dense<0.000000e+00> : vector<1xf32>
    %57 = vector.multi_reduction <add>, %56, %cst_34 [1] : vector<1x256xf32> to vector<1xf32>
    %58 = vector.shape_cast %57 : vector<1xf32> to vector<1x1xf32>
    %59 = math.log %58 : vector<1x1xf32>
    %60 = vector.broadcast %59 : vector<1x1xf32> to vector<1x256xf32>
    %61 = arith.subf %55, %60 : vector<1x256xf32>
    %c0_35 = arith.constant 0 : index
    %c0_36 = arith.constant 0 : index
    %62 = vector.load %arg7[%c0_35, %c0_36] : memref<1x256xf32, #tpu.memory_space<vmem>>, vector<1x256xf32>
    tpu.vector_store %arg7[%c0_35, %c0_36], %61 {strides = array<i32>} : memref<1x256xf32, #tpu.memory_space<vmem>>, vector<1x256xf32>,
    return
  }
  func.func @transform_0(%arg0: i32, %arg1: memref<8xi32, #tpu.memory_space<smem>>) -> (i32, i32) {
    %c0_i32 = arith.constant 0 : i32
    %c0_i32_0 = arith.constant 0 : i32
    %c0_i32_1 = arith.constant 0 : i32
    return %c0_i32, %c0_i32_0 : i32, i32
  }
  func.func @transform_1(%arg0: i32, %arg1: memref<8xi32, #tpu.memory_space<smem>>) -> (i32, i32) {
    %c0_i32 = arith.constant 0 : i32
    %c0_i32_0 = arith.constant 0 : i32
    %c0_i32_1 = arith.constant 0 : i32
    return %c0_i32, %c0_i32_0 : i32, i32
  }
  func.func @transform_2(%arg0: i32, %arg1: memref<8xi32, #tpu.memory_space<smem>>) -> (i32, i32) {
    %c0_i32 = arith.constant 0 : i32
    %c0_i32_0 = arith.constant 0 : i32
    %c0_i32_1 = arith.constant 0 : i32
    return %c0_i32, %c0_i32_0 : i32, i32
  }
  func.func @transform_3(%arg0: i32, %arg1: memref<8xi32, #tpu.memory_space<smem>>) -> (i32, i32) {
    %c0_i32 = arith.constant 0 : i32
    %c0_i32_0 = arith.constant 0 : i32
    %c0_i32_1 = arith.constant 0 : i32
    return %c0_i32, %c0_i32_0 : i32, i32
  }
  func.func @transform_4(%arg0: i32, %arg1: memref<8xi32, #tpu.memory_space<smem>>) -> (i32, i32) {
    %c0_i32 = arith.constant 0 : i32
    %c0_i32_0 = arith.constant 0 : i32
    %c0_i32_1 = arith.constant 0 : i32
    return %c0_i32, %c0_i32_0 : i32, i32
  }
  func.func @transform_5(%arg0: i32, %arg1: memref<8xi32, #tpu.memory_space<smem>>) -> (i32, i32) {
    %c0_i32 = arith.constant 0 : i32
    %c0_i32_0 = arith.constant 0 : i32
    %c0_i32_1 = arith.constant 0 : i32
    return %c0_i32, %c0_i32_0 : i32, i32
  }
}

</mosaic_0001>

<bundles_post_ra>
// kernel: tpu_custom_call.1
= control target key start
LH: loop header
LB: loop body
LE: loop exit
PB: predicated region body
PF: predicated region fallthrough
CT: control target
= control target key end

     0   :  { %s1664_s24 = smov [#allocation4]   ;;  %s1967_s0 = inlined_call_operand.vmem [shape: s32[8], index: 0, kind: input, shape index: {}]   ;;  %s1968_s1 = inlined_call_operand.vmem [shape: f32[256,16], index: 1, kind: input, shape index: {}]   ;;  %s1969_s2 = inlined_call_operand.hbm [shape: bf16[128,128], index: 2, kind: input, shape index: {}]   ;;  %s1970_s3 = inlined_call_operand.vmem [shape: bf16[128,512], index: 3, kind: input, shape index: {}]   ;;  %s1971_s4 = inlined_call_operand.hbm [shape: bf16[512,256], index: 4, kind: input, shape index: {}]   ;;  %s1972_s5 = inlined_call_operand.vmem [shape: f32[1,896], index: 5, kind: input, shape index: {}]   ;;  %s1973_s6 = inlined_call_operand.hbm [shape: f32[1,256], index: 6, kind: output, shape index: {}]  }
   0x1   :  { %s12_s23 = sshll.u32 %s1967_s0, 4  ;;  %s13_s23 = int_to_ptr.vmem [resolvable:$true] %s12_s23 }
   0x2   :  { %15 = dma.vmem_to_smem %s13_s23, 16, %s1664_s24, [#allocation3] }
   0x3   :  { %1656 = dma.done.wait [#allocation3], 16 }
   0x4   :  { %1657 = vsyncadd [#allocation3], 4294967280 }
   0x5   :  { %18 = sfence }
   0x6   :  { %19 = vsyncpa [#allocation6], 0 }
   0x7   :  { %20 = vsyncpa [#allocation9], 0 }
   0x8   :  { %21 = vsyncpa [#allocation7], 0  ;;  %s28_s27 = sshll.u32 %s1969_s2, 4  ;;  %s1665_s28 = smov [#allocation5]   ;;  %s29_s27 = int_to_ptr.hbm [resolvable:$true] %s28_s27 }
   0x9   :  { %s30_s29 = sshll.u32 %s1665_s28, 4  ;;  %s43_s0 = sshll.u32 %s1971_s4, 4  ;;  %s31_s29 = int_to_ptr.vmem [resolvable:$true] %s30_s29  ;;  %s44_s0 = int_to_ptr.hbm [resolvable:$true] %s43_s0 }
   0xa   :  { %s1666_s8 = smov 64   ;;  %s1667_s9 = smov 4  }
   0xb   :  { %36 = dma.hbm_to_vmem [thread:$0]  %s29_s27, 1024, %s31_s29, [#allocation6], %s1666_s8, %s1666_s8, %s1667_s9  }
   0xc   :  { %s1668_s10 = smov [#allocation8]   ;;  %s1669_s12 = smov 128  }
   0xd   :  { %s45_s11 = sshll.u32 %s1668_s10, 4  ;;  %s1670_s13 = smov 8   ;;  %s46_s11 = int_to_ptr.vmem [resolvable:$true] %s45_s11 }
   0xe   :  { %51 = dma.hbm_to_vmem [thread:$0]  %s44_s0, 8192, %s46_s11, [#allocation9], %s1669_s12, %s1669_s12, %s1670_s13  }
   0xf   :  { %1658 = dma.done.wait [#allocation6], 1024  }
  0x10   :  { %1659 = vsyncadd [#allocation6], 4294966272 }
  0x11   :  { %1660 = dma.done.wait [#allocation9], 8192  }
  0x12   :  { %1661 = vsyncadd [#allocation9], 4294959104  ;;  %s1025_s2 = sld [smem:[#allocation4 + $0x1]]  ;;  %v1455_v0 = vld [vmem:[#allocation5 + $0x38] sm:$0xff]  ;;  %s1671_s24 = smov 16   ;;  %v1454_v3 = vld [vmem:[#allocation5 + $0x30] sm:$0xff] }
  0x13   :  { %s1027_s14 = sld [smem:[#allocation4 + $0x3]]  ;;  %199 = vmatpush.bf16.msra.mxu0 %v1455_v0  ;;  %s1672_s25 = smov 48   ;;  %vm65_vm0 = vcmask 122880   ;;  %v1453_v10 = vld [vmem:[#allocation5 + $0x28] sm:$0xff]  ;;  %v1452_v11 = vld [vmem:[#allocation5 + $0x20] sm:$0xff]  ;;  %v1451_v12 = vld [vmem:[#allocation5 + $0x18] sm:$0xff] }
  0x14   :  { %s1026_s15 = sld [smem:[#allocation4 + $0x2]]  ;;  %s1673_s12 = smov 80   ;;  %v1450_v13 = vld [vmem:[#allocation5 + $0x10] sm:$0xff]  ;;  %v1449_v14 = vld [vmem:[#allocation5 + $0x8] sm:$0xff]  ;;  %v1448_v15 = vld [vmem:[#allocation5] sm:$0xff]  ;;  %vm74_vm1 = vcmask 254080  }
  0x15   :  { %s1028_s4 = sld [smem:[#allocation4 + $0x4]]  ;;  %v1178_v16 = vld [vmem:[%s1970_s3 + $0xe0] sm:$0xf]  ;;  %v1486_v17 = vld [vmem:[%s1970_s3 + $0xec] sm:$0xf0]  ;;  %vm83_vm2 = vcmask 385280  }
  0x16   :  { %s1029_s16 = sld [smem:[#allocation4 + $0x5]]  ;;  %v1484_v18 = vld [vmem:[%s1970_s3 + $0xe4] sm:$0xf]  ;;  %v1179_v19 = vor.u32 %v1486_v17, %v1178_v16  ;;  %v1180_v20 = vld [vmem:[%s1970_s3 + $0xf0] sm:$0xf0]  ;;  %vm92_vm3 = vcmask 516480  }
  0x17   :  { %s1030_s23 = sld [smem:[#allocation4 + $0x6]]  ;;  %200 = vmatpush.bf16.msra.mxu0 %v1454_v3  ;;  %v1186_v21 = vld [vmem:[%s1970_s3 + $0xe8] sm:$0xf]  ;;  %v1487_v22 = vld [vmem:[%s1970_s3 + $0xf4] sm:$0xf0]  ;;  %v1183_v23 = vor.u32 %v1484_v18, %v1180_v20  ;;  %vm101_vm4 = vcmask 647680  }
  0x18   :  { %s68_s19 = scalar_lea.vmem %s1968_s1, %s1025_s2  ;;  %s1031_s29 = sld [smem:[#allocation4 + $0x7]]  ;;  %v1187_v24 = vor.u32 %v1487_v22, %v1186_v21  ;;  %v1485_v25 = vld [vmem:[%s1970_s3 + $0xec] sm:$0xf]  ;;  %v1188_v26 = vld [vmem:[%s1970_s3 + $0xf8] sm:$0xf0]  ;;  %415 = vmatpush.bf16.msra.mxu1 %v1179_v19  ;;  %vm110_vm5 = vcmask 778880  }
  0x19   :  { %v69_v1 = vld [vmem:[%s68_s19] sm:$0x1]  ;;  %s86_s22 = scalar_lea.vmem %s1968_s1, %s1027_s14  ;;  %s1676_s19 = smov 112   ;;  %v1191_v28 = vor.u32 %v1485_v25, %v1188_v26  ;;  %v1482_v29 = vld [vmem:[%s1970_s3 + $0xcc] sm:$0xf0]  ;;  %428 = vmatpush.bf16.msra.mxu2 %v1183_v23  ;;  %vm119_vm6 = vcmask 910080  }
  0x1a   :  { %71 = vrot.lane.b32.xlu0 %v69_v1, %s1671_s24  ;;  %v87_v2 = vld [vmem:[%s86_s22] sm:$0x1]  ;;  %s77_s28 = scalar_lea.vmem %s1968_s1, %s1026_s15  ;;  %s1674_s15 = smov 32   ;;  %v1480_v30 = vld [vmem:[%s1970_s3 + $0xc4] sm:$0xf]  ;;  %441 = vmatpush.bf16.msra.mxu3 %v1187_v24  ;;  %vm128_vm7 = vcmask 1041280  }
  0x1b   :  { %89 = vrot.lane.b32.xlu1 %v87_v2, %s1672_s25  ;;  %s95_s0 = scalar_lea.vmem %s1968_s1, %s1028_s4  ;;  %v78_v5 = vld [vmem:[%s77_s28] sm:$0x1]  ;;  %s62_s20 = sld [smem:[#allocation4]]  ;;  %201 = vmatpush.bf16.msra.mxu0 %v1453_v10  ;;  %v1164_v31 = vld [vmem:[%s1970_s3 + $0xd0] sm:$0xf0]  ;;  %vm968_vm8 = vcmask 1040384  }
  0x1c   :  { %s104_s11 = scalar_lea.vmem %s1968_s1, %s1029_s16  ;;  %v96_v6 = vld [vmem:[%s95_s0] sm:$0x1]  ;;  %s1675_s16 = smov 96   ;;  %v1167_v33 = vor.u32 %v1480_v30, %v1164_v31  ;;  %v1170_v34 = vld [vmem:[%s1970_s3 + $0xc8] sm:$0xf] }
  0x1d   :  { %v105_v4 = vld [vmem:[%s104_s11] sm:$0x1]  ;;  %s113_s14 = scalar_lea.vmem %s1968_s1, %s1030_s23  ;;  %v1483_v35 = vld [vmem:[%s1970_s3 + $0xd4] sm:$0xf0]  ;;  %v1481_v36 = vld [vmem:[%s1970_s3 + $0xcc] sm:$0xf] }
  0x1e   :  { %107 = vrot.lane.b32.xlu2 %v105_v4, %s1673_s12  ;;  %s122_s18 = scalar_lea.vmem %s1968_s1, %s1031_s29  ;;  %v114_v7 = vld [vmem:[%s113_s14] sm:$0x1]  ;;  %v1171_v39 = vor.u32 %v1483_v35, %v1170_v34  ;;  %v1172_v40 = vld [vmem:[%s1970_s3 + $0xd8] sm:$0xf0]  ;;  %v1478_v42 = vld [vmem:[%s1970_s3 + $0xac] sm:$0xf0]  ;;  %429 = vmatpush.bf16.msra.mxu2 %v1167_v33 }
  0x1f   :  { %v123_v8 = vld [vmem:[%s122_s18] sm:$0x1]  ;;  %202 = vmatpush.bf16.msra.mxu0 %v1452_v11  ;;  %v1175_v44 = vor.u32 %v1481_v36, %v1172_v40  ;;  %v1476_v45 = vld [vmem:[%s1970_s3 + $0xa4] sm:$0xf]  ;;  %v1148_v46 = vld [vmem:[%s1970_s3 + $0xb0] sm:$0xf0] }
  0x20   :  { %v1162_v27 = vld [vmem:[%s1970_s3 + $0xc0] sm:$0xf]  ;;  %v1154_v48 = vld [vmem:[%s1970_s3 + $0xa8] sm:$0xf]  ;;  %v1479_v49 = vld [vmem:[%s1970_s3 + $0xb4] sm:$0xf0]  ;;  %442 = vmatpush.bf16.msra.mxu3 %v1171_v39  ;;  %v1151_v51 = vor.u32 %v1476_v45, %v1148_v46 }
  0x21   :  { %s63_s24 = scalar_lea.vmem %s1968_s1, %s62_s20  ;;  %v1163_v32 = vor.u32 %v1482_v29, %v1162_v27  ;;  %v1146_v41 = vld [vmem:[%s1970_s3 + $0xa0] sm:$0xf]  ;;  %v1477_v50 = vld [vmem:[%s1970_s3 + $0xac] sm:$0xf]  ;;  %v1155_v52 = vor.u32 %v1479_v49, %v1154_v48  ;;  %v1156_v53 = vld [vmem:[%s1970_s3 + $0xb8] sm:$0xf0] }
  0x22   :  { %80 = vrot.lane.b32.xlu0 %v78_v5, %s1674_s15  ;;  %v64_v9 = vld [vmem:[%s63_s24] sm:$0x1]  ;;  %v1147_v47 = vor.u32 %v1478_v42, %v1146_v41  ;;  %v1474_v55 = vld [vmem:[%s1970_s3 + $0x8c] sm:$0xf0]  ;;  %v1159_v56 = vor.u32 %v1477_v50, %v1156_v53  ;;  %v1472_v57 = vld [vmem:[%s1970_s3 + $0x84] sm:$0xf]  ;;  %430 = vmatpush.bf16.msra.mxu2 %v1151_v51 }
  0x23   :  { %98 = vrot.lane.b32.xlu1 %v96_v6, %s1666_s8  ;;  %66 = vst.msk [vmem:[#allocation2] sm:$0x1] %vm65_vm0, %v64_v9  ;;  %203 = vmatpush.bf16.msra.mxu0 %v1451_v12  ;;  %v1130_v54 = vld [vmem:[%s1970_s3 + $0x80] sm:$0xf]  ;;  %v1132_v58 = vld [vmem:[%s1970_s3 + $0x90] sm:$0xf0] }
  0x24   :  { %416 = vmatpush.bf16.msra.mxu1 %v1163_v32  ;;  %v1138_v59 = vld [vmem:[%s1970_s3 + $0x88] sm:$0xf]  ;;  %v1475_v60 = vld [vmem:[%s1970_s3 + $0x94] sm:$0xf0]  ;;  %v1473_v61 = vld [vmem:[%s1970_s3 + $0x8c] sm:$0xf]  ;;  %v1131_v63 = vor.u32 %v1474_v55, %v1130_v54  ;;  %443 = vmatpush.bf16.msra.mxu3 %v1155_v52  ;;  %v1135_v0 = vor.u32 %v1472_v57, %v1132_v58 }
  0x25   :  { %v1140_v62 = vld [vmem:[%s1970_s3 + $0x98] sm:$0xf0]  ;;  %v1139_v1 = vor.u32 %v1475_v60, %v1138_v59  ;;  %v1114_v2 = vld [vmem:[%s1970_s3 + $0x60] sm:$0xf]  ;;  %v1470_v3 = vld [vmem:[%s1970_s3 + $0x6c] sm:$0xf0] }
  0x26   :  { %116 = vrot.lane.b32.xlu2 %v114_v7, %s1675_s16  ;;  %v1468_v4 = vld [vmem:[%s1970_s3 + $0x64] sm:$0xf]  ;;  %v1143_v6 = vor.u32 %v1473_v61, %v1140_v62  ;;  %v1116_v7 = vld [vmem:[%s1970_s3 + $0x70] sm:$0xf0]  ;;  %v1471_v9 = vld [vmem:[%s1970_s3 + $0x74] sm:$0xf0]  ;;  %431 = vmatpush.bf16.msra.mxu2 %v1135_v0 }
  0x27   :  { %204 = vmatpush.bf16.msra.mxu0 %v1450_v13  ;;  %v1469_v11 = vld [vmem:[%s1970_s3 + $0x6c] sm:$0xf]  ;;  %v1124_v12 = vld [vmem:[%s1970_s3 + $0x78] sm:$0xf0]  ;;  %v1466_v16 = vld [vmem:[%s1970_s3 + $0x4c] sm:$0xf0]  ;;  %v1119_v17 = vor.u32 %v1468_v4, %v1116_v7 }
  0x28   :  { %417 = vmatpush.bf16.msra.mxu1 %v1147_v47  ;;  %444 = vmatpush.bf16.msra.mxu3 %v1139_v1  ;;  %v1464_v19 = vld [vmem:[%s1970_s3 + $0x44] sm:$0xf]  ;;  %v1100_v20 = vld [vmem:[%s1970_s3 + $0x50] sm:$0xf0]  ;;  %v1127_v21 = vor.u32 %v1469_v11, %v1124_v12  ;;  %v1106_v22 = vld [vmem:[%s1970_s3 + $0x48] sm:$0xf] }
  0x29   :  { %v1467_v23 = vld [vmem:[%s1970_s3 + $0x54] sm:$0xf0]  ;;  %v1465_v24 = vld [vmem:[%s1970_s3 + $0x4c] sm:$0xf]  ;;  %v1108_v25 = vld [vmem:[%s1970_s3 + $0x58] sm:$0xf0]  ;;  %v1103_v27 = vor.u32 %v1464_v19, %v1100_v20 }
  0x2a   :  { %125 = vrot.lane.b32.xlu0 %v123_v8, %s1676_s19  ;;  %v1122_v8 = vld [vmem:[%s1970_s3 + $0x68] sm:$0xf]  ;;  %432 = vmatpush.bf16.msra.mxu2 %v1119_v17  ;;  %v1111_v30 = vor.u32 %v1465_v24, %v1108_v25  ;;  %v1082_v33 = vld [vmem:[%s1970_s3 + $0x20] sm:$0xf]  ;;  %v1462_v34 = vld [vmem:[%s1970_s3 + $0x2c] sm:$0xf0] }
  0x2b   :  { %205 = vmatpush.bf16.msra.mxu0 %v1449_v14  ;;  %v1115_v14 = vor.u32 %v1470_v3, %v1114_v2  ;;  %v1123_v18 = vor.u32 %v1471_v9, %v1122_v8  ;;  %v1460_v35 = vld [vmem:[%s1970_s3 + $0x24] sm:$0xf]  ;;  %v1083_v36 = vor.u32 %v1462_v34, %v1082_v33  ;;  %v1463_v39 = vld [vmem:[%s1970_s3 + $0x34] sm:$0xf0]  ;;  %v1461_v42 = vld [vmem:[%s1970_s3 + $0x2c] sm:$0xf] }
  0x2c   :  { %418 = vmatpush.bf16.msra.mxu1 %v1131_v63  ;;  %v1066_v45 = vld [vmem:[%s1970_s3] sm:$0xf]  ;;  %v1458_v46 = vld [vmem:[%s1970_s3 + $0xc] sm:$0xf0]  ;;  %v1456_v47 = vld [vmem:[%s1970_s3 + $0x4] sm:$0xf] }
  0x2d   :  { %445 = vmatpush.bf16.msra.mxu3 %v1123_v18  ;;  %v1067_v48 = vor.u32 %v1458_v46, %v1066_v45  ;;  %v1068_v49 = vld [vmem:[%s1970_s3 + $0x10] sm:$0xf0]  ;;  %v1074_v50 = vld [vmem:[%s1970_s3 + $0x8] sm:$0xf]  ;;  %v1459_v51 = vld [vmem:[%s1970_s3 + $0x14] sm:$0xf0] }
  0x2e   :  { %433 = vmatpush.bf16.msra.mxu2 %v1103_v27  ;;  %v1071_v52 = vor.u32 %v1456_v47, %v1068_v49  ;;  %v1075_v53 = vor.u32 %v1459_v51, %v1074_v50  ;;  %v1457_v54 = vld [vmem:[%s1970_s3 + $0xc] sm:$0xf]  ;;  %v1076_v55 = vld [vmem:[%s1970_s3 + $0x18] sm:$0xf0]  ;;  %v1250_v57 = vld [vmem:[#allocation8 + $0x70] sm:$0xf] }
  0x2f   :  { %206 = vmatpush.bf16.msra.mxu0 %v1448_v15  ;;  %v1098_v15 = vld [vmem:[%s1970_s3 + $0x40] sm:$0xf]  ;;  %v1503_v58 = vld [vmem:[#allocation8 + $0x74] sm:$0xf0]  ;;  %v1442_v59 = vld [vmem:[#allocation8 + $0x1f0] sm:$0xf] }
  0x30   :  { %419 = vmatpush.bf16.msra.mxu1 %v1115_v14  ;;  %v1099_v26 = vor.u32 %v1466_v16, %v1098_v15  ;;  %v1251_v60 = vor.u32 %v1503_v58, %v1250_v57  ;;  %v1551_v61 = vld [vmem:[#allocation8 + $0x1f4] sm:$0xf0]  ;;  %v1242_v62 = vld [vmem:[#allocation8 + $0x60] sm:$0xf]  ;;  %v1501_v63 = vld [vmem:[#allocation8 + $0x64] sm:$0xf0] }
  0x31   :  { %v1443_v0 = vor.u32 %v1551_v61, %v1442_v59  ;;  %v1434_v1 = vld [vmem:[#allocation8 + $0x1e0] sm:$0xf]  ;;  %v1549_v2 = vld [vmem:[#allocation8 + $0x1e4] sm:$0xf0]  ;;  %v1314_v3 = vld [vmem:[#allocation8 + $0xf0] sm:$0xf]  ;;  %v1243_v4 = vor.u32 %v1501_v63, %v1242_v62 }
  0x32   :  { %v1535_v7 = vld [vmem:[#allocation8 + $0x174] sm:$0xf0]  ;;  %v1435_v8 = vor.u32 %v1549_v2, %v1434_v1  ;;  %v1234_v11 = vld [vmem:[#allocation8 + $0x50] sm:$0xf]  ;;  %v1306_v15 = vld [vmem:[#allocation8 + $0xe0] sm:$0xf] }
  0x33   :  { %454 = vmatpush.bf16.msrb.mxu0 %v1191_v28  ;;  %v1107_v28 = vor.u32 %v1467_v23, %v1106_v22  ;;  %v1499_v12 = vld [vmem:[#allocation8 + $0x54] sm:$0xf0]  ;;  %v1517_v16 = vld [vmem:[#allocation8 + $0xe4] sm:$0xf0]  ;;  %v1370_v18 = vld [vmem:[#allocation8 + $0x160] sm:$0xf] }
  0x34   :  { %420 = vmatpush.bf16.msra.mxu1 %v1099_v26  ;;  %v1547_v14 = vld [vmem:[#allocation8 + $0x1d4] sm:$0xf0]  ;;  %v1307_v17 = vor.u32 %v1517_v16, %v1306_v15  ;;  %v1533_v19 = vld [vmem:[#allocation8 + $0x164] sm:$0xf0]  ;;  %v1235_v20 = vor.u32 %v1499_v12, %v1234_v11  ;;  %v1226_v22 = vld [vmem:[#allocation8 + $0x40] sm:$0xf] }
  0x35   :  { %446 = vmatpush.bf16.msra.mxu3 %v1107_v28  ;;  %v1497_v23 = vld [vmem:[#allocation8 + $0x44] sm:$0xf0]  ;;  %v1298_v25 = vld [vmem:[#allocation8 + $0xd0] sm:$0xf]  ;;  %v1515_v26 = vld [vmem:[#allocation8 + $0xd4] sm:$0xf0] }
  0x36   :  { %v1362_v27 = vld [vmem:[#allocation8 + $0x150] sm:$0xf]  ;;  %v1418_v28 = vld [vmem:[#allocation8 + $0x1c0] sm:$0xf]  ;;  %v1227_v34 = vor.u32 %v1497_v23, %v1226_v22  ;;  %v1511_v47 = vld [vmem:[#allocation8 + $0xb4] sm:$0xf0] }
  0x37   :  { %455 = vmatpush.bf16.msrb.mxu0 %v1175_v44  ;;  %v1290_v33 = vld [vmem:[#allocation8 + $0xc0] sm:$0xf]  ;;  %v1282_v45 = vld [vmem:[#allocation8 + $0xb0] sm:$0xf]  ;;  %v1527_v49 = vld [vmem:[#allocation8 + $0x134] sm:$0xf0] }
  0x38   :  { %421 = vmatpush.bf16.msra.mxu1 %v1083_v36  ;;  %v1354_v36 = vld [vmem:[#allocation8 + $0x140] sm:$0xf]  ;;  %v1509_v59 = vld [vmem:[#allocation8 + $0xa4] sm:$0xf0]  ;;  %v1202_v63 = vld [vmem:[#allocation8 + $0x10] sm:$0xf] }
  0x39   :  { %v1210_v51 = vld [vmem:[#allocation8 + $0x20] sm:$0xf]  ;;  %v1525_v61 = vld [vmem:[#allocation8 + $0x124] sm:$0xf0]  ;;  %v1394_v1 = vld [vmem:[#allocation8 + $0x190] sm:$0xf] }
  0x3a   :  { %v1274_v57 = vld [vmem:[#allocation8 + $0xa0] sm:$0xf]  ;;  %v1539_v2 = vld [vmem:[#allocation8 + $0x194] sm:$0xf0]  ;;  %s1006_s20 = sshll.u32 %s1973_s6, 4  ;;  %s1007_s20 = int_to_ptr.hbm [resolvable:$true] %s1006_s20 }
  0x3b   :  { %456 = vmatpush.bf16.msrb.mxu0 %v1159_v56  ;;  %v1079_v56 = vor.u32 %v1457_v54, %v1076_v55  ;;  %v1541_v54 = vld [vmem:[#allocation8 + $0x1a4] sm:$0xf0]  ;;  %v1283_v55 = vor.u32 %v1511_v47, %v1282_v45  ;;  %v1395_v12 = vor.u32 %v1539_v2, %v1394_v1  ;;  %v1386_v16 = vld [vmem:[#allocation8 + $0x180] sm:$0xf]  ;;  %v1420_v1 = vld [vmem:[#allocation8 + $0x1c8] sm:$0xf0] }
  0x3c   :  { %422 = vmatpush.bf16.msra.mxu1 %v1067_v48  ;;  %v1346_v48 = vld [vmem:[#allocation8 + $0x130] sm:$0xf] }
  0x3f   :  { %457 = vmatpush.bf16.msrb.mxu0 %v1143_v6  ;;  %v1378_v6 = vld [vmem:[#allocation8 + $0x170] sm:$0xf] }
  0x40   :  { %864 = vmatpush.bf16.msrb.mxu1 %v1251_v60  ;;  %v1338_v60 = vld [vmem:[#allocation8 + $0x120] sm:$0xf] }
  0x43   :  { %458 = vmatpush.bf16.msrb.mxu0 %v1127_v21  ;;  %v1371_v21 = vor.u32 %v1533_v19, %v1370_v18  ;;  %v1502_v18 = vld [vmem:[#allocation8 + $0x74] sm:$0xf]  ;;  %v1252_v19 = vld [vmem:[#allocation8 + $0x78] sm:$0xf0] }
  0x44   :  { %865 = vmatpush.bf16.msrb.mxu1 %v1243_v4  ;;  %v1275_v4 = vor.u32 %v1509_v59, %v1274_v57  ;;  %v1372_v59 = vld [vmem:[#allocation8 + $0x168] sm:$0xf0] }
  0x47   :  { %459 = vmatpush.bf16.msrb.mxu0 %v1111_v30  ;;  %v1531_v30 = vld [vmem:[#allocation8 + $0x154] sm:$0xf0] }
  0x48   :  { %866 = vmatpush.bf16.msrb.mxu1 %v1235_v20  ;;  %v1550_v20 = vld [vmem:[#allocation8 + $0x1f4] sm:$0xf] }
  0x4c   :  { %867 = vmatpush.bf16.msrb.mxu1 %v1227_v34  ;;  %v1534_v34 = vld [vmem:[#allocation8 + $0x174] sm:$0xf] }
  0x78   :  { %v1794_v38 = vpop.permute.xlu2 %107 }
  0x80   :  { %v117_v13 = vpop.permute.xlu2 %116 }
  0x8c   :  { %v72_v37 = vpop.permute.xlu0 %71 }
  0x8d   :  { %75 = vst.msk [vmem:[#allocation2] sm:$0x1] %vm74_vm1, %v72_v37  ;;  %v90_v43 = vpop.permute.xlu1 %89  ;;  %v1084_v37 = vld [vmem:[%s1970_s3 + $0x30] sm:$0xf0] }
  0x8e   :  { %v1087_v40 = vor.u32 %v1460_v35, %v1084_v37  ;;  %v1513_v35 = vld [vmem:[#allocation8 + $0xc4] sm:$0xf0] }
  0x8f   :  { %v1529_v37 = vld [vmem:[#allocation8 + $0x144] sm:$0xf0] }
  0x90   :  { %434 = vmatpush.bf16.msra.mxu2 %v1087_v40  ;;  %v1495_v40 = vld [vmem:[#allocation8 + $0x34] sm:$0xf0] }
  0x94   :  { %v81_v5 = vpop.permute.xlu0 %80  ;;  %435 = vmatpush.bf16.msra.mxu2 %v1071_v52  ;;  %v1493_v52 = vld [vmem:[#allocation8 + $0x24] sm:$0xf0] }
  0x95   :  { %84 = vst.msk [vmem:[#allocation2] sm:$0x1] %vm83_vm2, %v81_v5  ;;  %v99_v10 = vpop.permute.xlu1 %98  ;;  %v1519_v5 = vld [vmem:[#allocation8 + $0xf4] sm:$0xf0]  ;;  %v1211_v58 = vor.u32 %v1493_v52, %v1210_v51  ;;  %v1546_v51 = vld [vmem:[#allocation8 + $0x1d4] sm:$0xf] }
  0x96   :  { %93 = vst.msk [vmem:[#allocation2] sm:$0x1] %vm92_vm3, %v90_v43  ;;  %v1092_v43 = vld [vmem:[%s1970_s3 + $0x38] sm:$0xf0]  ;;  %v1315_v9 = vor.u32 %v1519_v5, %v1314_v3  ;;  %v132_v3 = vld [vmem:[%s1972_s5] sm:$0x1]  ;;  %v1339_v5 = vor.u32 %v1525_v61, %v1338_v60 }
  0x97   :  { %102 = vst.msk [vmem:[#allocation2] sm:$0x1] %vm101_vm4, %v99_v10  ;;  %v1095_v44 = vor.u32 %v1461_v42, %v1092_v43  ;;  %v1379_v10 = vor.u32 %v1535_v7, %v1378_v6  ;;  %v1543_v42 = vld [vmem:[#allocation8 + $0x1b4] sm:$0xf0]  ;;  %v1291_v43 = vor.u32 %v1513_v35, %v1290_v33  ;;  %v1266_v6 = vld [vmem:[#allocation8 + $0x90] sm:$0xf] }
  0x98   :  { %111 = vst.msk [vmem:[#allocation2] sm:$0x1] %vm110_vm5, %v1794_v38  ;;  %v1090_v38 = vld [vmem:[%s1970_s3 + $0x28] sm:$0xf]  ;;  %877 = vmatpush.bf16.msrb.mxu2 %v1315_v9  ;;  %v1330_v9 = vld [vmem:[#allocation8 + $0x110] sm:$0xf] }
  0x99   :  { %120 = vst.msk [vmem:[#allocation2] sm:$0x1] %vm119_vm6, %v117_v13  ;;  %v1091_v41 = vor.u32 %v1463_v39, %v1090_v38  ;;  %460 = vmatpush.bf16.msrb.mxu0 %v1095_v44  ;;  %v1426_v13 = vld [vmem:[#allocation8 + $0x1d0] sm:$0xf]  ;;  %v1355_v44 = vor.u32 %v1529_v37, %v1354_v36  ;;  %v1316_v33 = vld [vmem:[#allocation8 + $0xf8] sm:$0xf0]  ;;  %v1255_v36 = vor.u32 %v1502_v18, %v1252_v19 }
  0x9a   :  { %v1427_v24 = vor.u32 %v1547_v14, %v1426_v13  ;;  %v1218_v39 = vld [vmem:[#allocation8 + $0x30] sm:$0xf]  ;;  %v1194_v13 = vld [vmem:[#allocation8] sm:$0xf]  ;;  %v1489_v14 = vld [vmem:[#allocation8 + $0x4] sm:$0xf0] }
  0x9b   :  { %447 = vmatpush.bf16.msra.mxu3 %v1091_v41  ;;  %v1410_v41 = vld [vmem:[#allocation8 + $0x1b0] sm:$0xf]  ;;  %v1219_v46 = vor.u32 %v1495_v40, %v1218_v39  ;;  %v1380_v35 = vld [vmem:[#allocation8 + $0x178] sm:$0xf0]  ;;  %v1244_v39 = vld [vmem:[#allocation8 + $0x68] sm:$0xf0] }
  0x9c   :  { %v126_v29 = vpop.permute.xlu0 %125  ;;  %878 = vmatpush.bf16.msrb.mxu2 %v1307_v17  ;;  %v1411_v50 = vor.u32 %v1543_v42, %v1410_v41  ;;  %v1537_v17 = vld [vmem:[#allocation8 + $0x184] sm:$0xf0]  ;;  %v1548_v40 = vld [vmem:[#allocation8 + $0x1e4] sm:$0xf]  ;;  %v1436_v41 = vld [vmem:[#allocation8 + $0x1e8] sm:$0xf0] }
  0x9d   :  { %129 = vst.msk [vmem:[#allocation2] sm:$0x1] %vm128_vm7, %v126_v29  ;;  %461 = vmatpush.bf16.msrb.mxu0 %v1079_v56  ;;  %v1545_v29 = vld [vmem:[#allocation8 + $0x1c4] sm:$0xf0]  ;;  %v1347_v56 = vor.u32 %v1527_v49, %v1346_v48  ;;  %868 = vmatpush.bf16.msrb.mxu1 %v1219_v46  ;;  %v1383_v46 = vor.u32 %v1534_v34, %v1380_v35  ;;  %v1498_v49 = vld [vmem:[#allocation8 + $0x54] sm:$0xf] }
  0x9e   :  { %v1419_v38 = vor.u32 %v1545_v29, %v1418_v28  ;;  %v1521_v28 = vld [vmem:[#allocation8 + $0x104] sm:$0xf0]  ;;  %v1518_v29 = vld [vmem:[#allocation8 + $0xf4] sm:$0xf]  ;;  %v1439_v48 = vor.u32 %v1548_v40, %v1436_v41  ;;  %v1496_v61 = vld [vmem:[#allocation8 + $0x44] sm:$0xf] }
  0x9f   :  { %448 = vmatpush.bf16.msra.mxu3 %v1075_v53  ;;  %v1402_v53 = vld [vmem:[#allocation8 + $0x1a0] sm:$0xf]  ;;  %v1319_v45 = vor.u32 %v1518_v29, %v1316_v33  ;;  %v1356_v19 = vld [vmem:[#allocation8 + $0x148] sm:$0xf0]  ;;  %v1526_v29 = vld [vmem:[#allocation8 + $0x134] sm:$0xf] }
  0xa0   :  { %v1403_v62 = vor.u32 %v1541_v54, %v1402_v53  ;;  %v1428_v53 = vld [vmem:[#allocation8 + $0x1d8] sm:$0xf0]  ;;  %v1490_v33 = vld [vmem:[#allocation8 + $0x14] sm:$0xf] }
  0xa1   :  { %869 = vmatpush.bf16.msrb.mxu1 %v1211_v58  ;;  %v1431_v54 = vor.u32 %v1546_v51, %v1428_v53  ;;  %v1532_v58 = vld [vmem:[#allocation8 + $0x164] sm:$0xf]  ;;  %v1204_v34 = vld [vmem:[#allocation8 + $0x18] sm:$0xf0]  ;;  %v1538_v35 = vld [vmem:[#allocation8 + $0x194] sm:$0xf] }
  0xa2   :  { %v1375_v60 = vor.u32 %v1532_v58, %v1372_v59  ;;  %v1506_v51 = vld [vmem:[#allocation8 + $0x94] sm:$0xf]  ;;  %v1260_v58 = vld [vmem:[#allocation8 + $0x88] sm:$0xf0]  ;;  %v1520_v59 = vld [vmem:[#allocation8 + $0x104] sm:$0xf] }
  0xa3   :  { %890 = vmatpush.bf16.msrb.mxu3 %v1379_v10  ;;  %v1523_v10 = vld [vmem:[#allocation8 + $0x114] sm:$0xf0]  ;;  %v1522_v53 = vld [vmem:[#allocation8 + $0x114] sm:$0xf] }
  0xa4   :  { %v130_v31 = vld [vmem:[#allocation2] sm:$0x1]  ;;  %v1331_v23 = vor.u32 %v1523_v10, %v1330_v9  ;;  %v1494_v9 = vld [vmem:[#allocation8 + $0x34] sm:$0xf] }
  0xa5   :  { %v131_v32 = vpack.c.bf16 %v130_v31, %v130_v31  ;;  %v1299_v31 = vor.u32 %v1515_v26, %v1298_v25  ;;  %v1258_v25 = vld [vmem:[#allocation8 + $0x80] sm:$0xf]  ;;  %v1505_v26 = vld [vmem:[#allocation8 + $0x84] sm:$0xf0]  ;;  %v1220_v10 = vld [vmem:[#allocation8 + $0x38] sm:$0xf0] }
  0xa6   :  { %v1259_v42 = vor.u32 %v1505_v26, %v1258_v25  ;;  %v1404_v25 = vld [vmem:[#allocation8 + $0x1a8] sm:$0xf0] }
  0xa7   :  { %207 = vmatmul.bf16.vlgmr.msra.gmra.mxu0 %v131_v32  ;;  %891 = vmatpush.bf16.msrb.mxu3 %v1371_v21  ;;  %v1363_v32 = vor.u32 %v1531_v30, %v1362_v27  ;;  %v1444_v21 = vld [vmem:[#allocation8 + $0x1f8] sm:$0xf0]  ;;  %v1322_v27 = vld [vmem:[#allocation8 + $0x100] sm:$0xf] }
  0xa8   :  { %903 = vmatpush.bf16.msra.mxu0 %v1443_v0  ;;  %879 = vmatpush.bf16.msrb.mxu2 %v1299_v31  ;;  %v1491_v0 = vld [vmem:[#allocation8 + $0x14] sm:$0xf0]  ;;  %v1195_v31 = vor.u32 %v1489_v14, %v1194_v13  ;;  %v1447_v37 = vor.u32 %v1550_v20, %v1444_v21  ;;  %v1412_v13 = vld [vmem:[#allocation8 + $0x1b8] sm:$0xf0]  ;;  %v1492_v21 = vld [vmem:[#allocation8 + $0x24] sm:$0xf] }
  0xa9   :  { %v1203_v7 = vor.u32 %v1491_v0, %v1202_v63  ;;  %v1544_v63 = vld [vmem:[#allocation8 + $0x1c4] sm:$0xf] }
  0xaa   :  { %v1423_v2 = vor.u32 %v1544_v63, %v1420_v1 }
  0xab   :  { %892 = vmatpush.bf16.msrb.mxu3 %v1363_v32  ;;  %870 = vmatpush.bf16.msrb.mxu1 %v1203_v7  ;;  %v1387_v32 = vor.u32 %v1537_v17, %v1386_v16  ;;  %v1364_v7 = vld [vmem:[#allocation8 + $0x158] sm:$0xf0]  ;;  %v1292_v16 = vld [vmem:[#allocation8 + $0xc8] sm:$0xf0]  ;;  %v1528_v17 = vld [vmem:[#allocation8 + $0x144] sm:$0xf] }
  0xac   :  { %904 = vmatpush.bf16.msra.mxu0 %v1435_v8  ;;  %880 = vmatpush.bf16.msrb.mxu2 %v1291_v43  ;;  %v1507_v8 = vld [vmem:[#allocation8 + $0x94] sm:$0xf0]  ;;  %v1323_v43 = vor.u32 %v1521_v28, %v1322_v27  ;;  %v1359_v20 = vor.u32 %v1528_v17, %v1356_v19  ;;  %v1510_v27 = vld [vmem:[#allocation8 + $0xb4] sm:$0xf]  ;;  %v1284_v28 = vld [vmem:[#allocation8 + $0xb8] sm:$0xf0] }
  0xad   :  { %v1267_v22 = vor.u32 %v1507_v8, %v1266_v6 }
  0xaf   :  { %893 = vmatpush.bf16.msrb.mxu3 %v1355_v44  ;;  %871 = vmatpush.bf16.msrb.mxu1 %v1195_v31  ;;  %v1348_v31 = vld [vmem:[#allocation8 + $0x138] sm:$0xf0] }
  0xb0   :  { %905 = vmatpush.bf16.msra.mxu0 %v1427_v24  ;;  %881 = vmatpush.bf16.msrb.mxu2 %v1283_v55  ;;  %v1516_v55 = vld [vmem:[#allocation8 + $0xe4] sm:$0xf] }
  0xb3   :  { %894 = vmatpush.bf16.msrb.mxu3 %v1347_v56  ;;  %v1308_v56 = vld [vmem:[#allocation8 + $0xe8] sm:$0xf0] }
  0xb4   :  { %906 = vmatpush.bf16.msra.mxu0 %v1419_v38  ;;  %882 = vmatpush.bf16.msrb.mxu2 %v1275_v4  ;;  %v1500_v38 = vld [vmem:[#allocation8 + $0x64] sm:$0xf]  ;;  %v1311_v57 = vor.u32 %v1516_v55, %v1308_v56  ;;  %v1300_v4 = vld [vmem:[#allocation8 + $0xd8] sm:$0xf0] }
  0xb5   :  { %v1247_v47 = vor.u32 %v1500_v38, %v1244_v39  ;;  %v1508_v38 = vld [vmem:[#allocation8 + $0xa4] sm:$0xf]  ;;  %v1276_v39 = vld [vmem:[#allocation8 + $0xa8] sm:$0xf0]  ;;  %v1332_v55 = vld [vmem:[#allocation8 + $0x118] sm:$0xf0] }
  0xb6   :  { %v1279_v41 = vor.u32 %v1508_v38, %v1276_v39  ;;  %v1335_v56 = vor.u32 %v1522_v53, %v1332_v55 }
  0xb7   :  { %895 = vmatpush.bf16.msrb.mxu3 %v1339_v5  ;;  %v1530_v5 = vld [vmem:[#allocation8 + $0x154] sm:$0xf] }
  0xb8   :  { %907 = vmatpush.bf16.msra.mxu0 %v1411_v50  ;;  %883 = vmatpush.bf16.msrb.mxu2 %v1267_v22  ;;  %v1236_v50 = vld [vmem:[#allocation8 + $0x58] sm:$0xf0]  ;;  %v1367_v8 = vor.u32 %v1530_v5, %v1364_v7  ;;  %v1212_v22 = vld [vmem:[#allocation8 + $0x28] sm:$0xf0] }
  0xb9   :  { %v1239_v52 = vor.u32 %v1498_v49, %v1236_v50 }
  0xbb   :  { %896 = vmatpush.bf16.msrb.mxu3 %v1331_v23  ;;  %v1540_v23 = vld [vmem:[#allocation8 + $0x1a4] sm:$0xf] }
  0xbc   :  { %908 = vmatpush.bf16.msra.mxu0 %v1403_v62  ;;  %884 = vmatpush.bf16.msrb.mxu2 %v1259_v42  ;;  %v1228_v62 = vld [vmem:[#allocation8 + $0x48] sm:$0xf0]  ;;  %v1407_v26 = vor.u32 %v1540_v23, %v1404_v25  ;;  %v1524_v42 = vld [vmem:[#allocation8 + $0x124] sm:$0xf] }
  0xbd   :  { %v1231_v0 = vor.u32 %v1496_v61, %v1228_v62  ;;  %v1324_v61 = vld [vmem:[#allocation8 + $0x108] sm:$0xf0]  ;;  %v133_v62 = vld [vmem:[%s1972_s5 + $0x1] sm:$0xf] }
  0xbe   :  { %v1327_v63 = vor.u32 %v1520_v59, %v1324_v61  ;;  %v410_v1 = vperm.slane %v133_v62, 3  ;;  %v408_v7 = vperm.slane %v133_v62, 1 }
  0xbf   :  { %897 = vmatpush.bf16.msrb.mxu3 %v1323_v43  ;;  %v1340_v43 = vld [vmem:[#allocation8 + $0x128] sm:$0xf0] }
  0xc0   :  { %909 = vmatpush.bf16.msra.mxu0 %v1395_v12  ;;  %v1542_v12 = vld [vmem:[#allocation8 + $0x1b4] sm:$0xf] }
  0xc1   :  { %v1415_v14 = vor.u32 %v1542_v12, %v1412_v13 }
  0xc4   :  { %910 = vmatpush.bf16.msra.mxu0 %v1387_v32  ;;  %v1351_v32 = vor.u32 %v1526_v29, %v1348_v31 }
 0x124   :  { %v208_v11 = vpop.f32.mrf.mxu0 }
 0x125   :  { %v209_v15 = vadd.f32 %v208_v11, %v132_v3  ;;  %v1514_v3 = vld [vmem:[#allocation8 + $0xd4] sm:$0xf]  ;;  %v1223_v11 = vor.u32 %v1494_v9, %v1220_v10  ;;  %v409_v9 = vperm.slane %v133_v62, 2 }
 0x126   :  { %v1303_v6 = vor.u32 %v1514_v3, %v1300_v4 }
 0x127   :  { %v212_v24 = vmax.f32 %v209_v15, 0.0  ;;  %v1512_v15 = vld [vmem:[#allocation8 + $0xc4] sm:$0xf] }
 0x128   :  { %v1295_v18 = vor.u32 %v1512_v15, %v1292_v16 }
 0x129   :  { %v213_v30 = vpack.c.bf16 %v212_v24, %v212_v24  ;;  %v1215_v24 = vor.u32 %v1492_v21, %v1212_v22 }
 0x12b   :  { %423 = vmatmul.bf16.vlgmr.msra.gmra.mxu1 %v213_v30  ;;  %436 = vmatmul.bf16.vlgmr.msra.gmra.mxu2 %v213_v30 }
 0x12c   :  { %449 = vmatmul.bf16.vlgmr.msra.gmra.mxu3 %v213_v30  ;;  %462 = vmatmul.bf16.vlgmr.msrb.gmra.mxu0 %v213_v30  ;;  %v210_v44 = vpop.f32.mrf.mxu0  ;;  %v1287_v30 = vor.u32 %v1510_v27, %v1284_v28 }
 0x12d   :  { %916 = vmatpush.bf16.msra.mxu1 %v1255_v36  ;;  %955 = vmatpush.bf16.msrb.mxu0 %v1447_v37  ;;  %v1207_v36 = vor.u32 %v1490_v33, %v1204_v34  ;;  %v1396_v37 = vld [vmem:[#allocation8 + $0x198] sm:$0xf0]  ;;  %v1488_v44 = vld [vmem:[#allocation8 + $0x4] sm:$0xf] }
 0x12e   :  { %929 = vmatpush.bf16.msra.mxu2 %v1319_v45  ;;  %942 = vmatpush.bf16.msra.mxu3 %v1383_v46  ;;  %v1399_v40 = vor.u32 %v1538_v35, %v1396_v37  ;;  %v1343_v45 = vor.u32 %v1524_v42, %v1340_v43  ;;  %v1196_v46 = vld [vmem:[#allocation8 + $0x8] sm:$0xf0] }
 0x12f   :  { %v1199_v49 = vor.u32 %v1488_v44, %v1196_v46 }
 0x131   :  { %917 = vmatpush.bf16.msra.mxu1 %v1247_v47  ;;  %956 = vmatpush.bf16.msrb.mxu0 %v1439_v48  ;;  %v1536_v47 = vld [vmem:[#allocation8 + $0x184] sm:$0xf]  ;;  %v1388_v48 = vld [vmem:[#allocation8 + $0x188] sm:$0xf0] }
 0x132   :  { %930 = vmatpush.bf16.msra.mxu2 %v1311_v57  ;;  %943 = vmatpush.bf16.msra.mxu3 %v1375_v60  ;;  %v1391_v50 = vor.u32 %v1536_v47, %v1388_v48  ;;  %v1504_v57 = vld [vmem:[#allocation8 + $0x84] sm:$0xf] }
 0x133   :  { %v1263_v60 = vor.u32 %v1504_v57, %v1260_v58 }
 0x135   :  { %918 = vmatpush.bf16.msra.mxu1 %v1239_v52  ;;  %957 = vmatpush.bf16.msrb.mxu0 %v1431_v54  ;;  %v1268_v52 = vld [vmem:[#allocation8 + $0x98] sm:$0xf0] }
 0x136   :  { %931 = vmatpush.bf16.msra.mxu2 %v1303_v6  ;;  %944 = vmatpush.bf16.msra.mxu3 %v1367_v8  ;;  %v1271_v54 = vor.u32 %v1506_v51, %v1268_v52 }
 0x139   :  { %919 = vmatpush.bf16.msra.mxu1 %v1231_v0  ;;  %958 = vmatpush.bf16.msrb.mxu0 %v1423_v2  ;;  %v407_v0 = vperm.slane %v133_v62, 0 }
 0x13a   :  { %932 = vmatpush.bf16.msra.mxu2 %v1295_v18  ;;  %945 = vmatpush.bf16.msra.mxu3 %v1359_v20 }
 0x13d   :  { %920 = vmatpush.bf16.msra.mxu1 %v1223_v11  ;;  %959 = vmatpush.bf16.msrb.mxu0 %v1415_v14 }
 0x13e   :  { %933 = vmatpush.bf16.msra.mxu2 %v1287_v30  ;;  %946 = vmatpush.bf16.msra.mxu3 %v1351_v32  ;;  %v134_v30 = vld [vmem:[%s1972_s5 + $0x5] sm:$0x3]  ;;  %s1677_s5 = smov [#allocation10]  }
 0x13f   :  { %v860_v32 = vperm.slane %v134_v30, 0  ;;  %v861_v38 = vperm.slane %v134_v30, 1  ;;  %s1004_s18 = sshll.u32 %s1677_s5, 4  ;;  %s1005_s18 = int_to_ptr.vmem [resolvable:$true] %s1004_s18 }
 0x141   :  { %921 = vmatpush.bf16.msra.mxu1 %v1215_v24  ;;  %960 = vmatpush.bf16.msrb.mxu0 %v1407_v26 }
 0x142   :  { %934 = vmatpush.bf16.msra.mxu2 %v1279_v41  ;;  %947 = vmatpush.bf16.msra.mxu3 %v1343_v45 }
 0x145   :  { %922 = vmatpush.bf16.msra.mxu1 %v1207_v36  ;;  %961 = vmatpush.bf16.msrb.mxu0 %v1399_v40 }
 0x146   :  { %935 = vmatpush.bf16.msra.mxu2 %v1271_v54  ;;  %948 = vmatpush.bf16.msra.mxu3 %v1335_v56 }
 0x149   :  { %923 = vmatpush.bf16.msra.mxu1 %v1199_v49  ;;  %962 = vmatpush.bf16.msrb.mxu0 %v1391_v50 }
 0x14a   :  { %936 = vmatpush.bf16.msra.mxu2 %v1263_v60  ;;  %949 = vmatpush.bf16.msra.mxu3 %v1327_v63 }
 0x1a8   :  { %v424_v2 = vpop.f32.mrf.mxu1 }
 0x1a9   :  { %v425_v3 = vadd.f32 %v424_v2, %v407_v0  ;;  %v463_v4 = vpop.f32.mrf.mxu0 }
 0x1aa   :  { %v464_v5 = vadd.f32 %v463_v4, %v410_v1 }
 0x1ab   :  { %v467_v6 = vmax.f32 %v425_v3, 0.0  ;;  %v994_v3 = vlaneseq }
 0x1ac   :  { %v470_v8 = vmax.f32 %v464_v5, 0.0 }
 0x1ad   :  { %v471_v10 = vpack.c.bf16 %v467_v6, %v467_v6  ;;  %vm996_vm9 = vcmp.lt.s32.totalorder %v994_v3, 256 }
 0x1ae   :  { %v474_v11 = vpack.c.bf16 %v470_v8, %v470_v8  ;;  %v437_v12 = vpop.f32.mrf.mxu2 }
 0x1af   :  { %v438_v13 = vadd.f32 %v437_v12, %v408_v7  ;;  %v450_v14 = vpop.f32.mrf.mxu3  ;;  %872 = vmatmul.bf16.vlgmr.msrb.gmra.mxu1 %v471_v10 }
 0x1b0   :  { %v451_v15 = vadd.f32 %v450_v14, %v409_v9  ;;  %911 = vmatmul.bf16.vlgmr.msra.gmra.mxu0 %v474_v11  ;;  %v426_v16 = vpop.f32.mrf.mxu1 }
 0x1b1   :  { %v468_v17 = vmax.f32 %v438_v13, 0.0  ;;  %v465_v18 = vpop.f32.mrf.mxu0 }
 0x1b2   :  { %v469_v19 = vmax.f32 %v451_v15, 0.0 }
 0x1b3   :  { %v472_v20 = vpack.c.bf16 %v468_v17, %v468_v17 }
 0x1b4   :  { %v473_v21 = vpack.c.bf16 %v469_v19, %v469_v19 }
 0x1b5   :  { %885 = vmatmul.bf16.vlgmr.msrb.gmra.mxu2 %v472_v20 }
 0x1b6   :  { %898 = vmatmul.bf16.vlgmr.msrb.gmra.mxu3 %v473_v21  ;;  %v439_v22 = vpop.f32.mrf.mxu2 }
 0x1b7   :  { %v452_v23 = vpop.f32.mrf.mxu3 }
 0x1bf   :  { %924 = vmatmul.bf16.vlgmr.msra.gmra.mxu1 %v471_v10 }
 0x1c0   :  { %963 = vmatmul.bf16.vlgmr.msrb.gmra.mxu0 %v474_v11 }
 0x1c5   :  { %937 = vmatmul.bf16.vlgmr.msra.gmra.mxu2 %v472_v20 }
 0x1c6   :  { %950 = vmatmul.bf16.vlgmr.msra.gmra.mxu3 %v473_v21 }
 0x22c   :  { %v873_v24 = vpop.f32.mrf.mxu1 }
 0x22d   :  { %v912_v25 = vpop.f32.mrf.mxu0  ;;  %v874_v35 = vadd.f32 %v873_v24, %v860_v32 }
 0x234   :  { %v875_v26 = vpop.f32.mrf.mxu1 }
 0x235   :  { %v914_v27 = vpop.f32.mrf.mxu0 }
 0x238   :  { %v886_v28 = vpop.f32.mrf.mxu2 }
 0x239   :  { %v899_v29 = vpop.f32.mrf.mxu3  ;;  %v887_v37 = vadd.f32 %v886_v28, %v874_v35 }
 0x23b   :  { %v900_v41 = vadd.f32 %v899_v29, %v887_v37 }
 0x23c   :  { %v925_v31 = vpop.f32.mrf.mxu1 }
 0x23d   :  { %v964_v33 = vpop.f32.mrf.mxu0  ;;  %v926_v42 = vadd.f32 %v925_v31, %v861_v38  ;;  %v913_v46 = vadd.f32 %v912_v25, %v900_v41 }
 0x23f   :  { %v969_v49 = vsel %vm968_vm8, %v913_v46, -inf }
 0x240   :  { %v888_v34 = vpop.f32.mrf.mxu2 }
 0x241   :  { %v901_v36 = vpop.f32.mrf.mxu3 }
 0x244   :  { %v927_v39 = vpop.f32.mrf.mxu1 }
 0x245   :  { %v966_v40 = vpop.f32.mrf.mxu0 }
 0x248   :  { %v938_v43 = vpop.f32.mrf.mxu2 }
 0x249   :  { %v939_v44 = vadd.f32 %v938_v43, %v926_v42  ;;  %v951_v45 = vpop.f32.mrf.mxu3 }
 0x24b   :  { %v952_v47 = vadd.f32 %v951_v45, %v939_v44 }
 0x24d   :  { %v965_v48 = vadd.f32 %v964_v33, %v952_v47 }
 0x24f   :  { %v970_v50 = vsel %vm968_vm8, %v965_v48, -inf }
 0x250   :  { %v940_v51 = vpop.f32.mrf.mxu2  ;;  %v971_v52 = vmax.f32 %v969_v49, %v970_v50 }
 0x251   :  { %v953_v53 = vpop.f32.mrf.mxu3 }
 0x252   :  { %972 = vmax.xlane.f32.xlu1 %v971_v52 }
 0x2c5   :  { %v973_v54 = vpop.xlane.xlu1 %972 }
 0x2c6   :  { %v974_v55 = vsub.f32 %v913_v46, %v973_v54  ;;  %v975_v56 = vsub.f32 %v965_v48, %v973_v54 }
 0x2c8   :  { %v976_v57 = vmul.f32 1.442695, %v974_v55  ;;  %v978_v58 = vmul.f32 1.442695, %v975_v56 }
 0x2ca   :  { %1566 = vpow2.f32 %v976_v57 }
 0x2cb   :  { %1568 = vpow2.f32 %v978_v58 }
 0x2d0   :  { %v1567_v59 = vpop.eup %1566 }
 0x2d1   :  { %v1569_v60 = vpop.eup %1568  ;;  %v980_v61 = vsel %vm968_vm8, %v1567_v59, 0.0 }
 0x2d2   :  { %v981_v62 = vsel %vm968_vm8, %v1569_v60, 0.0 }
 0x2d3   :  { %v982_v63 = vadd.f32 %v981_v62, %v980_v61 }
 0x2d5   :  { %983 = vadd.xlane.f32.xlu2 %v982_v63 }
 0x348   :  { %v984_v0 = vpop.xlane.xlu2 %983 }
 0x349   :  { %1570 = vlog2.f32 %v984_v0 }
 0x34f   :  { %v1571_v1 = vpop.eup %1570 }
 0x350   :  { %v986_v2 = vmul.f32 0.6931472, %v1571_v1 }
 0x352   :  { %v988_v4 = vsub.f32 %v975_v56, %v986_v2  ;;  %v987_v5 = vsub.f32 %v974_v55, %v986_v2 }
 0x354   :  { %v991_v6 = vrot.slane %v988_v4, 7 }
 0x356   :  { %v992_v7 = vsel %vm968_vm8, %v987_v5, %v991_v6 }
 0x357   :  { %998 = vst.msk [vmem:[#allocation10] sm:$0x3] %vm996_vm9, %v992_v7 }
 0x358   :  { %1009 = dma.vmem_to_hbm [thread:$0]  %s1005_s18, 32, %s1007_s20, [#allocation7]  }
 0x359   :  { %1662 = dma.done.wait [#allocation7], 32  }
 0x35a   :  { %1663 = vsyncadd [#allocation7], 4294967264 }
 0x35b   :  { %1014 = vsyncpa [#allocation6], 1 }
 0x35c   :  { %1015 = vsyncpa [#allocation9], 1 }
 0x35d   :  { %1016 = vsyncpa [#allocation7], 1 }

</bundles_post_ra>
